<compile_context>
chip_gen: v6e
topology: v6e:2x2x1
jax: 0.10.0
libtpu: 0.0.40
codegen_flags: <defaults>
</compile_context>

<pallas_src>
import functools

import jax
import jax.numpy as jnp
from jax.experimental import pallas as pl
from jax.experimental.pallas import tpu as pltpu


def _round_up(v, m):
    return ((v + m - 1) // m) * m


def _channel_attention_kernel(x_ref, w1_ref, w2_ref, o_ref, sum_ref, max_ref,
                              *, total_s, block_s, needs_mask):
    s = pl.program_id(1)
    last_s = pl.num_programs(1) - 1

    @pl.when(s == 0)
    def _init():
        sum_ref[...] = jnp.zeros_like(sum_ref)
        max_ref[...] = jnp.full_like(max_ref, -jnp.inf)

    x = x_ref[0].astype(jnp.float32)            # (C, block_s); spatial chunk on lanes

    def _accumulate(xs, xm):
        sum_ref[...] += jnp.sum(xs, axis=1, keepdims=True)                    # (C, 1)
        max_ref[...] = jnp.maximum(max_ref[...],
                                   jnp.max(xm, axis=1, keepdims=True))        # (C, 1)

    if needs_mask:
        # Only the last S tile is ragged; full tiles take the unmasked path.
        @pl.when(s != last_s)
        def _full_tile():
            _accumulate(x, x)

        @pl.when(s == last_s)
        def _tail_tile():
            pos = s * block_s + jax.lax.broadcasted_iota(jnp.int32, (1, block_s), 1)
            valid = pos < total_s                                             # (1, block_s)
            _accumulate(jnp.where(valid, x, 0.0), jnp.where(valid, x, -jnp.inf))
    else:
        _accumulate(x, x)

    @pl.when(s == last_s)
    def _finalize():
        inv_s = 1.0 / float(total_s)
        avg = sum_ref[...] * inv_s                                            # (C, 1)
        mx = max_ref[...]                                                     # (C, 1)
        # Shared MLP (1x1x1 convs == matmuls): Conv3d(C->hidden) -> ReLU -> Conv3d(hidden->C).
        h_a = jnp.maximum(jnp.dot(w1_ref[...], avg,
                                  preferred_element_type=jnp.float32), 0.0)   # (hidden, 1)
        h_m = jnp.maximum(jnp.dot(w1_ref[...], mx,
                                  preferred_element_type=jnp.float32), 0.0)   # (hidden, 1)
        o = (jnp.dot(w2_ref[...], h_a, preferred_element_type=jnp.float32)
             + jnp.dot(w2_ref[...], h_m, preferred_element_type=jnp.float32))  # (C, 1)
        o_ref[0] = jax.nn.sigmoid(o)


def _pick_block_s(S, C, itemsize, target_bytes=8 * 1024 * 1024):
    # Target ~8 MiB per streamed tile, counting VMEM padding:
    # sublane-padded C (to 8) x lane-aligned block_s (to 128).
    c_pad = _round_up(C, 8)
    cap = max(128, (target_bytes // (c_pad * itemsize)) // 128 * 128)
    return S if S <= cap else cap


def channel_attention_module(x, w1, w2, *, block_s=None):
    """x: (N, C, D, H, W) float (f32 or bf16; accumulation is f32).
    w1: (C//ratio, C, 1, 1, 1)  -- first Conv3d weight (no bias)
    w2: (C, C//ratio, 1, 1, 1)  -- second Conv3d weight (no bias)
    Returns (N, C, 1, 1, 1) sigmoid attention weights (float32).
    """
    N, C, D, H, W = x.shape
    hidden = w1.shape[0]
    S = D * H * W
    itemsize = jnp.dtype(x.dtype).itemsize

    # Native layout: free reshape of contiguous NCDHW, no host transpose / extra HBM pass.
    x_ncs = x.reshape(N, C, S)
    w1m = w1.reshape(hidden, C).astype(jnp.float32)   # (hidden, C)
    w2m = w2.reshape(C, hidden).astype(jnp.float32)   # (C, hidden)

    if block_s is None:
        block_s = _pick_block_s(S, C, itemsize)
    if block_s >= S:
        block_s = S                                   # single full-extent tile
    else:
        block_s = max(128, block_s - block_s % 128)   # lane (128) rule when tiled
    num_s_blocks = pl.cdiv(S, block_s)
    needs_mask = (S % block_s) != 0

    kernel = functools.partial(_channel_attention_kernel,
                               total_s=S, block_s=block_s, needs_mask=needs_mask)

    # VMEM budget with sublane/lane padding accounted for; cap at 48 MiB so the
    # double-buffered tiles + weights + scratch fit v7x's 64 MiB physical VMEM.
    c_pad = _round_up(C, 8)
    x_tile_bytes = c_pad * _round_up(block_s, 128) * itemsize
    small_bytes = (2 * _round_up(hidden, 8) * _round_up(C, 128)   # both weights
                   + 2 * c_pad * 128                              # sum/max accumulators
                   + c_pad * 128) * 4                             # output tile
    computed = 2 * x_tile_bytes + 2 * small_bytes + (4 << 20)
    vmem_limit = int(min(48 << 20, max(32 << 20, computed)))

    # TODO(synk): on v7x with N == 1, add a second "parallel" grid axis that
    # splits S across the two TensorCores and combine the partial pools in a
    # tiny epilogue; with N >= 2 the batch axis already shards across cores.
    out = pl.pallas_call(
        kernel,
        out_shape=jax.ShapeDtypeStruct((N, C, 1), jnp.float32),
        grid_spec=pltpu.PrefetchScalarGridSpec(
            num_scalar_prefetch=0,
            grid=(N, num_s_blocks),
            in_specs=[
                pl.BlockSpec((1, C, block_s), lambda b, s: (b, 0, s)),
                pl.BlockSpec((hidden, C), lambda b, s: (0, 0)),
                pl.BlockSpec((C, hidden), lambda b, s: (0, 0)),
            ],
            out_specs=pl.BlockSpec((1, C, 1), lambda b, s: (b, 0, 0)),
            scratch_shapes=[
                pltpu.VMEM((C, 1), jnp.float32),   # running sum
                pltpu.VMEM((C, 1), jnp.float32),   # running max
            ],
        ),
        compiler_params=pltpu.CompilerParams(
            dimension_semantics=("parallel", "arbitrary"),
            vmem_limit_bytes=vmem_limit),
    )(x_ncs, w1m, w2m)

    return out.reshape(N, C, 1, 1, 1)


def _reference(x, w1, w2):
    # Pure-JAX reference matching the PyTorch forward.
    N, C = x.shape[:2]
    hidden = w1.shape[0]
    avg = jnp.mean(x.astype(jnp.float32), axis=(2, 3, 4))   # (N, C)
    mx = jnp.max(x.astype(jnp.float32), axis=(2, 3, 4))     # (N, C)
    w1m = w1.reshape(hidden, C).astype(jnp.float32)
    w2m = w2.reshape(C, hidden).astype(jnp.float32)

    def mlp(p):
        h = jnp.maximum(p @ w1m.T, 0.0)
        return h @ w2m.T

    out = jax.nn.sigmoid(mlp(avg) + mlp(mx))
    return out.reshape(N, C, 1, 1, 1)


if __name__ == "__main__":
    key = jax.random.PRNGKey(0)
    k_x, k_w1, k_w2 = jax.random.split(key, 3)

    N, C, ratio = 2, 32, 16
    D, H, W = 5, 6, 7              # S = 210
    hidden = C // ratio            # 2

    x = jax.random.normal(k_x, (N, C, D, H, W), dtype=jnp.float32)
    # Deterministic synthetic Conv3d weights (kaiming-ish scale).
    w1 = jax.random.normal(k_w1, (hidden, C, 1, 1, 1), dtype=jnp.float32) * (2.0 / C) ** 0.5
    w2 = jax.random.normal(k_w2, (C, hidden, 1, 1, 1), dtype=jnp.float32) * (2.0 / hidden) ** 0.5

    ref = _reference(x, w1, w2)

    # Multi-tile path: block_s=128 -> 2 S-steps, exercises accumulator + masked ragged tail.
    out_tiled = jax.block_until_ready(channel_attention_module(x, w1, w2, block_s=128))
    # Default path: single full-extent (C, S) tile, no masking.
    out_single = jax.block_until_ready(channel_attention_module(x, w1, w2))

    assert out_tiled.shape == (N, C, 1, 1, 1)
    assert jnp.allclose(out_tiled, ref, atol=1e-5, rtol=1e-5), "tiled mismatch vs reference"
    assert jnp.allclose(out_single, ref, atol=1e-5, rtol=1e-5), "single-tile mismatch vs reference"

    print("KERNEL_OK")
</pallas_src>

<mosaic_0001>
module attributes {stable_mosaic.version = 11 : i64} {
  func.func @_channel_attention_kernel(%arg0: i32, %arg1: i32, %arg2: memref<1x32x128xf32, #tpu.memory_space<vmem>>, %arg3: memref<2x32xf32, #tpu.memory_space<vmem>>, %arg4: memref<32x2xf32, #tpu.memory_space<vmem>>, %arg5: memref<1x32x1xf32, #tpu.memory_space<vmem>>, %arg6: memref<32x1xf32, #tpu.memory_space<vmem>>, %arg7: memref<32x1xf32, #tpu.memory_space<vmem>>) attributes {dimension_semantics = [#tpu.dimension_semantics<parallel>, #tpu.dimension_semantics<arbitrary>], iteration_bounds = array<i64: 2, 2>, scalar_prefetch = 0 : i64, scratch_operands = 2 : i64, tpu.core_type = #tpu.core_type<tc>, window_params = [{transform_indices = @transform_0, window_bounds = array<i64: 1, 32, 128>}, {pipeline_mode = #tpu.pipeline_mode<synchronous>, transform_indices = @transform_1, window_bounds = array<i64: 2, 32>}, {pipeline_mode = #tpu.pipeline_mode<synchronous>, transform_indices = @transform_2, window_bounds = array<i64: 32, 2>}, {transform_indices = @transform_3, window_bounds = array<i64: 1, 32, 1>}]} {
    %c0_i32 = arith.constant 0 : i32
    %0 = arith.cmpi eq, %arg1, %c0_i32 : i32
    %1 = arith.extui %0 : i1 to i32
    %c0_i32_0 = arith.constant 0 : i32
    %2 = arith.cmpi ne, %1, %c0_i32_0 : i32
    scf.if %2 {
      %cst = arith.constant 0.000000e+00 : f32
      %14 = vector.broadcast %cst : f32 to vector<32x1xf32>
      %c0_8 = arith.constant 0 : index
      %c0_9 = arith.constant 0 : index
      %15 = vector.load %arg6[%c0_8, %c0_9] : memref<32x1xf32, #tpu.memory_space<vmem>>, vector<32x1xf32>
      tpu.vector_store %arg6[%c0_8, %c0_9], %14 {strides = array<i32>} : memref<32x1xf32, #tpu.memory_space<vmem>>, vector<32x1xf32>,
      %cst_10 = arith.constant 0xFF800000 : f32
      %16 = vector.broadcast %cst_10 : f32 to vector<32x1xf32>
      %c0_11 = arith.constant 0 : index
      %c0_12 = arith.constant 0 : index
      %17 = vector.load %arg7[%c0_11, %c0_12] : memref<32x1xf32, #tpu.memory_space<vmem>>, vector<32x1xf32>
      tpu.vector_store %arg7[%c0_11, %c0_12], %16 {strides = array<i32>} : memref<32x1xf32, #tpu.memory_space<vmem>>, vector<32x1xf32>,
    } else {
    }
    %c0 = arith.constant 0 : index
    %c0_1 = arith.constant 0 : index
    %c0_2 = arith.constant 0 : index
    %3 = vector.load %arg2[%c0, %c0_1, %c0_2] : memref<1x32x128xf32, #tpu.memory_space<vmem>>, vector<1x32x128xf32>
    %4 = vector.shape_cast %3 : vector<1x32x128xf32> to vector<32x128xf32>
    %c1_i32 = arith.constant 1 : i32
    %5 = arith.cmpi ne, %arg1, %c1_i32 : i32
    %6 = arith.extui %5 : i1 to i32
    %c0_i32_3 = arith.constant 0 : i32
    %7 = arith.cmpi ne, %6, %c0_i32_3 : i32
    scf.if %7 {
      %c0_8 = arith.constant 0 : index
      %c0_9 = arith.constant 0 : index
      %14 = vector.load %arg6[%c0_8, %c0_9] : memref<32x1xf32, #tpu.memory_space<vmem>>, vector<32x1xf32>
      %cst = arith.constant dense<0.000000e+00> : vector<32xf32>
      %15 = vector.multi_reduction <add>, %4, %cst [1] : vector<32x128xf32> to vector<32xf32>
      %16 = vector.shape_cast %15 : vector<32xf32> to vector<32x1xf32>
      %17 = arith.addf %14, %16 : vector<32x1xf32>
      %c0_10 = arith.constant 0 : index
      %c0_11 = arith.constant 0 : index
      %18 = vector.load %arg6[%c0_10, %c0_11] : memref<32x1xf32, #tpu.memory_space<vmem>>, vector<32x1xf32>
      tpu.vector_store %arg6[%c0_10, %c0_11], %17 {strides = array<i32>} : memref<32x1xf32, #tpu.memory_space<vmem>>, vector<32x1xf32>,
      %c0_12 = arith.constant 0 : index
      %c0_13 = arith.constant 0 : index
      %19 = vector.load %arg7[%c0_12, %c0_13] : memref<32x1xf32, #tpu.memory_space<vmem>>, vector<32x1xf32>
      %cst_14 = arith.constant dense<0xFF800000> : vector<32xf32>
      %20 = vector.multi_reduction <maximumf>, %4, %cst_14 [1] : vector<32x128xf32> to vector<32xf32>
      %21 = vector.shape_cast %20 : vector<32xf32> to vector<32x1xf32>
      %22 = arith.maximumf %19, %21 : vector<32x1xf32>
      %c0_15 = arith.constant 0 : index
      %c0_16 = arith.constant 0 : index
      %23 = vector.load %arg7[%c0_15, %c0_16] : memref<32x1xf32, #tpu.memory_space<vmem>>, vector<32x1xf32>
      tpu.vector_store %arg7[%c0_15, %c0_16], %22 {strides = array<i32>} : memref<32x1xf32, #tpu.memory_space<vmem>>, vector<32x1xf32>,
    } else {
    }
    %c1_i32_4 = arith.constant 1 : i32
    %8 = arith.cmpi eq, %arg1, %c1_i32_4 : i32
    %9 = arith.extui %8 : i1 to i32
    %c0_i32_5 = arith.constant 0 : i32
    %10 = arith.cmpi ne, %9, %c0_i32_5 : i32
    scf.if %10 {
      %c128_i32 = arith.constant 128 : i32
      %14 = arith.muli %arg1, %c128_i32 : i32
      %15 = tpu.iota {dimensions = array<i32: 1>} : vector<1x128xi32>
      %16 = vector.broadcast %14 : i32 to vector<1x128xi32>
      %17 = arith.addi %16, %15 : vector<1x128xi32>
      %c210_i32 = arith.constant 210 : i32
      %18 = vector.broadcast %c210_i32 : i32 to vector<1x128xi32>
      %19 = arith.cmpi slt, %17, %18 : vector<1x128xi32>
      %cst = arith.constant 0.000000e+00 : f32
      %20 = vector.shape_cast %19 : vector<1x128xi1> to vector<1x128xi1>
      %21 = vector.broadcast %20 : vector<1x128xi1> to vector<32x128xi1>
      %22 = vector.broadcast %cst : f32 to vector<32x128xf32>
      %23 = arith.select %21, %4, %22 : vector<32x128xi1>, vector<32x128xf32>
      %cst_8 = arith.constant 0xFF800000 : f32
      %24 = vector.shape_cast %19 : vector<1x128xi1> to vector<1x128xi1>
      %25 = vector.broadcast %24 : vector<1x128xi1> to vector<32x128xi1>
      %26 = vector.broadcast %cst_8 : f32 to vector<32x128xf32>
      %27 = arith.select %25, %4, %26 : vector<32x128xi1>, vector<32x128xf32>
      %c0_9 = arith.constant 0 : index
      %c0_10 = arith.constant 0 : index
      %28 = vector.load %arg6[%c0_9, %c0_10] : memref<32x1xf32, #tpu.memory_space<vmem>>, vector<32x1xf32>
      %cst_11 = arith.constant dense<0.000000e+00> : vector<32xf32>
      %29 = vector.multi_reduction <add>, %23, %cst_11 [1] : vector<32x128xf32> to vector<32xf32>
      %30 = vector.shape_cast %29 : vector<32xf32> to vector<32x1xf32>
      %31 = arith.addf %28, %30 : vector<32x1xf32>
      %c0_12 = arith.constant 0 : index
      %c0_13 = arith.constant 0 : index
      %32 = vector.load %arg6[%c0_12, %c0_13] : memref<32x1xf32, #tpu.memory_space<vmem>>, vector<32x1xf32>
      tpu.vector_store %arg6[%c0_12, %c0_13], %31 {strides = array<i32>} : memref<32x1xf32, #tpu.memory_space<vmem>>, vector<32x1xf32>,
      %c0_14 = arith.constant 0 : index
      %c0_15 = arith.constant 0 : index
      %33 = vector.load %arg7[%c0_14, %c0_15] : memref<32x1xf32, #tpu.memory_space<vmem>>, vector<32x1xf32>
      %cst_16 = arith.constant dense<0xFF800000> : vector<32xf32>
      %34 = vector.multi_reduction <maximumf>, %27, %cst_16 [1] : vector<32x128xf32> to vector<32xf32>
      %35 = vector.shape_cast %34 : vector<32xf32> to vector<32x1xf32>
      %36 = arith.maximumf %33, %35 : vector<32x1xf32>
      %c0_17 = arith.constant 0 : index
      %c0_18 = arith.constant 0 : index
      %37 = vector.load %arg7[%c0_17, %c0_18] : memref<32x1xf32, #tpu.memory_space<vmem>>, vector<32x1xf32>
      tpu.vector_store %arg7[%c0_17, %c0_18], %36 {strides = array<i32>} : memref<32x1xf32, #tpu.memory_space<vmem>>, vector<32x1xf32>,
    } else {
    }
    %c1_i32_6 = arith.constant 1 : i32
    %11 = arith.cmpi eq, %arg1, %c1_i32_6 : i32
    %12 = arith.extui %11 : i1 to i32
    %c0_i32_7 = arith.constant 0 : i32
    %13 = arith.cmpi ne, %12, %c0_i32_7 : i32
    scf.if %13 {
      %c0_8 = arith.constant 0 : index
      %c0_9 = arith.constant 0 : index
      %14 = vector.load %arg6[%c0_8, %c0_9] : memref<32x1xf32, #tpu.memory_space<vmem>>, vector<32x1xf32>
      %cst = arith.constant 0.00476190494 : f32
      %15 = vector.broadcast %cst : f32 to vector<32x1xf32>
      %16 = arith.mulf %14, %15 : vector<32x1xf32>
      %c0_10 = arith.constant 0 : index
      %c0_11 = arith.constant 0 : index
      %17 = vector.load %arg7[%c0_10, %c0_11] : memref<32x1xf32, #tpu.memory_space<vmem>>, vector<32x1xf32>
      %c0_12 = arith.constant 0 : index
      %c0_13 = arith.constant 0 : index
      %18 = vector.load %arg3[%c0_12, %c0_13] : memref<2x32xf32, #tpu.memory_space<vmem>>, vector<2x32xf32>
      %cst_14 = arith.constant dense<0.000000e+00> : vector<2x1xf32>
      %19 = tpu.matmul %18, %16, %cst_14 {dimension_numbers = #tpu.dot_dimension_numbers<[1], [0], [0], [1], [0, 0, 1, 1], [], []>} : vector<2x32xf32>, vector<32x1xf32>, vector<2x1xf32> -> vector<2x1xf32>
      %cst_15 = arith.constant 0.000000e+00 : f32
      %20 = vector.broadcast %cst_15 : f32 to vector<2x1xf32>
      %21 = arith.maximumf %19, %20 : vector<2x1xf32>
      %c0_16 = arith.constant 0 : index
      %c0_17 = arith.constant 0 : index
      %22 = vector.load %arg3[%c0_16, %c0_17] : memref<2x32xf32, #tpu.memory_space<vmem>>, vector<2x32xf32>
      %cst_18 = arith.constant dense<0.000000e+00> : vector<2x1xf32>
      %23 = tpu.matmul %22, %17, %cst_18 {dimension_numbers = #tpu.dot_dimension_numbers<[1], [0], [0], [1], [0, 0, 1, 1], [], []>} : vector<2x32xf32>, vector<32x1xf32>, vector<2x1xf32> -> vector<2x1xf32>
      %cst_19 = arith.constant 0.000000e+00 : f32
      %24 = vector.broadcast %cst_19 : f32 to vector<2x1xf32>
      %25 = arith.maximumf %23, %24 : vector<2x1xf32>
      %c0_20 = arith.constant 0 : index
      %c0_21 = arith.constant 0 : index
      %26 = vector.load %arg4[%c0_20, %c0_21] : memref<32x2xf32, #tpu.memory_space<vmem>>, vector<32x2xf32>
      %cst_22 = arith.constant dense<0.000000e+00> : vector<32x1xf32>
      %27 = tpu.matmul %26, %21, %cst_22 {dimension_numbers = #tpu.dot_dimension_numbers<[1], [0], [0], [1], [0, 0, 1, 1], [], []>} : vector<32x2xf32>, vector<2x1xf32>, vector<32x1xf32> -> vector<32x1xf32>
      %c0_23 = arith.constant 0 : index
      %c0_24 = arith.constant 0 : index
      %28 = vector.load %arg4[%c0_23, %c0_24] : memref<32x2xf32, #tpu.memory_space<vmem>>, vector<32x2xf32>
      %cst_25 = arith.constant dense<0.000000e+00> : vector<32x1xf32>
      %29 = tpu.matmul %28, %25, %cst_25 {dimension_numbers = #tpu.dot_dimension_numbers<[1], [0], [0], [1], [0, 0, 1, 1], [], []>} : vector<32x2xf32>, vector<2x1xf32>, vector<32x1xf32> -> vector<32x1xf32>
      %30 = arith.addf %27, %29 : vector<32x1xf32>
      %31 = arith.negf %30 : vector<32x1xf32>
      %32 = math.exp %31 : vector<32x1xf32>
      %cst_26 = arith.constant 1.000000e+00 : f32
      %33 = vector.broadcast %cst_26 : f32 to vector<32x1xf32>
      %34 = arith.addf %33, %32 : vector<32x1xf32>
      %35 = arith.divf %33, %34 : vector<32x1xf32>
      %c0_27 = arith.constant 0 : index
      %c0_28 = arith.constant 0 : index
      %c0_29 = arith.constant 0 : index
      %36 = vector.load %arg5[%c0_27, %c0_28, %c0_29] : memref<1x32x1xf32, #tpu.memory_space<vmem>>, vector<1x32x1xf32>
      %37 = vector.shape_cast %36 : vector<1x32x1xf32> to vector<32x1xf32>
      %38 = vector.shape_cast %35 : vector<32x1xf32> to vector<1x32x1xf32>
      tpu.vector_store %arg5[%c0_27, %c0_28, %c0_29], %38 {strides = array<i32>} : memref<1x32x1xf32, #tpu.memory_space<vmem>>, vector<1x32x1xf32>,
    } else {
    }
    return
  }
  func.func @transform_0(%arg0: i32, %arg1: i32) -> (i32, i32, i32) {
    %c0_i32 = arith.constant 0 : i32
    %c0_i32_0 = arith.constant 0 : i32
    return %arg0, %c0_i32, %arg1 : i32, i32, i32
  }
  func.func @transform_1(%arg0: i32, %arg1: i32) -> (i32, i32) {
    %c0_i32 = arith.constant 0 : i32
    %c0_i32_0 = arith.constant 0 : i32
    %c0_i32_1 = arith.constant 0 : i32
    return %c0_i32, %c0_i32_0 : i32, i32
  }
  func.func @transform_2(%arg0: i32, %arg1: i32) -> (i32, i32) {
    %c0_i32 = arith.constant 0 : i32
    %c0_i32_0 = arith.constant 0 : i32
    %c0_i32_1 = arith.constant 0 : i32
    return %c0_i32, %c0_i32_0 : i32, i32
  }
  func.func @transform_3(%arg0: i32, %arg1: i32) -> (i32, i32, i32) {
    %c0_i32 = arith.constant 0 : i32
    %c0_i32_0 = arith.constant 0 : i32
    %c0_i32_1 = arith.constant 0 : i32
    return %arg0, %c0_i32, %c0_i32_0 : i32, i32, i32
  }
}

</mosaic_0001>

<bundles_post_ra>
// kernel: tpu_custom_call.1
= control target key start
LH: loop header
LB: loop body
LE: loop exit
PB: predicated region body
PF: predicated region fallthrough
CT: control target
= control target key end

     0   :  { %8 = vsyncpa [#allocation5], 0  ;;  %s1298_s0 = inlined_call_operand.hbm [shape: f32[2,32,210], index: 0, kind: input, shape index: {}]   ;;  %s1299_s1 = inlined_call_operand.vmem [shape: f32[2,32], index: 1, kind: input, shape index: {}]   ;;  %s1300_s2 = inlined_call_operand.vmem [shape: f32[32,2], index: 2, kind: input, shape index: {}]   ;;  %s1301_s3 = inlined_call_operand.vmem [shape: f32[2,32,1], index: 3, kind: output, shape index: {}]  }
   0x1   :  { %10 = vsyncpa [#allocation5 + $0x1], 0  ;;  %s1100_s12 = smov 0   ;;  %s1102_s13 = smov 0  }
   0x2   :  { %s1104_s14 = smov 0   ;;  %s1106_s15 = smov 0  }
   0x3   :  { %s1108_s16 = smov 0   ;;  %s1110_s17 = smov 0  }
   0x4   :  { %s1112_s18 = smov 0   ;;  %s1114_s19 = smov 0  }
   0x5 LB: > { %s790_s20 = sadd.s32 4294967295, %s1070_s19   ;;  %s25_s21 = sadd.s32 1, %s1062_s17  ;;  %s1070_s19 = sphi %s1114_s19, %s16_s19   ;;  %s1066_s18 = sphi %s1112_s18, %s1311_s18   ;;  %s1062_s17 = sphi %s1110_s17, %s1310_s17   ;;  %s1058_s16 = sphi %s1108_s16, %s1309_s16   ;;  %s1054_s15 = sphi %s1106_s15, %s1308_s15   ;;  %s1050_s14 = sphi %s1104_s14, %s1307_s14   ;;  %s1046_s13 = sphi %s1102_s13, %s1306_s13   ;;  %s1042_s12 = sphi %s1100_s12, %s1305_s12  }
   0x6   : > { %p26_p0 = scmp.ge.s32.totalorder %s25_s21, 2  ;;  %s28_s22 = sadd.s32 1, %s1066_s18 }
   0x7   : > { %s37_s23 = sadd.s32 1, %s1050_s14  ;;  %p44_p1 = scmp.ne.s32.totalorder %s1050_s14, %s1046_s13 }
   0x8   : > { %s1313_s21 = smov (%p26_p0, %s25_s21), 0  ;;  %s1315_s22 = smov (!%p26_p0, %s28_s22), %s1066_s18 }
   0x9   : > { %s33_s24 = ssub.s32 %s1062_s17, %s1313_s21  ;;  %p45_p2 = scmp.eq.s32.totalorder %s1070_s19, 0 }
   0xa   : > { %p30_p3 = scmp.ge.s32.totalorder %s1315_s22, 2  ;;  %p50_p4 = scmp.ne.s32.totalorder %s1046_s13, %s1042_s12 }
   0xb   : > { %p1151_p5 = por %p45_p2, %p44_p1  ;;  %p51_p6 = scmp.eq.s32.totalorder %s790_s20, 0 }
   0xc   : > { %s1317_s22 = smov (%p30_p3, %s1315_s22), 0  ;;  %p888_p8 = scmp.lt.s32.totalorder %s1070_s19, 4 }
   0xd   : > { %p1157_p7 = por %p51_p6, %p50_p4  ;;  %s32_s27 = ssub.s32 %s1066_s18, %s1317_s22 }
   0xe   : > { %s34_s28 = sor.u32 %s33_s24, %s32_s27  ;;  %s148_s29 = sand.u32 1, %s1050_s14  }
   0xf   : > { %p35_p9 = scmp.eq.s32.totalorder %s34_s28, 0  ;;  %s794_s30 = sshll.u32 %s148_s29, 5 }
  0x10   : > { %s795_s4 = sshll.u32 %s1066_s18, 3  ;;  %s152_s8 = scalar_lea.vmem [#allocation4], %s794_s30 }
  0x11   : > { %s1167_s5 = scalar_select %p35_p9, %s1050_s14, %s37_s23  }
  0x12   : > { %s157_s6 = sadd.s32 %s1062_s17, %s795_s4  ;;  %s160_s9 = sshll.u32 %s152_s8, 4  ;;  %s161_s9 = int_to_ptr.vmem [resolvable:$true] %s160_s9 }
  0x13   : > { %s796_s7 = sshll.u32 %s157_s6, 7  ;;  %p1177_p10 = pnand %p888_p8, %p1151_p5 }
  0x14   : > { %s159_s12 = scalar_lea.hbm %s1298_s0, %s796_s7  ;;  %p797_p11 = scmp.ge.s32.totalorder %s1070_s19, 1 }
  0x15   : > { %s149_s24 = scalar_lea.sflag [#allocation5], %s148_s29  ;;  %p978_p12 = pneg %p1177_p10 }
  0x16   : > { %s989_s23 = scalar_lea.vmem %s161_s9, 512  ;;  %s1072_s27 = smov [#allocation4]  }
  0x17   : > { %p990_p13 = scmp.ne.s32.totalorder %s161_s9, %s989_s23  ;;  %s994_s28 = sshll.u32 %s1072_s27, 4  ;;  %s995_s28 = int_to_ptr.vmem [resolvable:$false] %s994_s28 }
  0x18   : > { %s996_s30 = scalar_lea.vmem %s995_s28, 1024  ;;  %p997_p2 = scmp.lt.s32.totalorder %s161_s9, %s995_s28 }
  0x19   : > { %p992_p0 = pnand %p990_p13, %p978_p12  ;;  %p998_p3 = scmp.lt.s32.totalorder %s996_s30, %s989_s23 }
  0x1b   : > { %p993_p1 = pneg %p992_p0  ;;  %p999_p4 = por %p998_p3, %p997_p2 }
  0x1d   : > { %p1000_p5 = pnand %p999_p4, %p993_p1 }
  0x1f   : > { %1003 = shalt.err (!%p1000_p5)
}
  0x20   : > { %s1073_s25 = smov 256   ;;  %s1074_s29 = smov 128  }
  0x21   : > { %s1075_s4 = smov 8   ;;  %p168_p6 = scmp.lt.s32.totalorder %s1070_s19, 5 }
  0x22   : > { %887 = dma.hbm_to_vmem [thread:$0]  (!%p1177_p10), %s159_s12, 512, %s161_s9, %s149_s24, %s1073_s25, %s1074_s29, %s1075_s4  }
  0x23   : > { %p169_p8 = pnand %p797_p11, %p168_p6 }
  0x24   : > { %s174_s6 = sand.u32 (!%p169_p8), 1, %s1046_s13  }
  0x25   : > { %172 = sbr.rel (%p169_p8) target bundleno = 824 (0x338), region = 32  ;;  %s798_s7 = sshll.u32 (!%p169_p8), %s174_s6, 5 }
  0x26   : > { %s175_s8 = scalar_lea.sflag (!%p169_p8), [#allocation5], %s174_s6  ;;  %s178_s10 = scalar_lea.vmem (!%p169_p8), [#allocation4], %s798_s7 }
  0x2a   : > { %1037 = dma.done.wait (%p1157_p7), %s175_s8, 512  }
  0x2b   : > { %1039 = vsyncadd (%p1157_p7), %s175_s8, 4294966784  ;;  %p201_p9 = scmp.lt.s32.totalorder %s1058_s16, 1  ;;  %p801_p10 = scmp.ne.s32.totalorder %s1054_s15, 0 }
  0x2d   : > { %s1319_s16 = smov (!%p201_p9, %s1058_s16), 1  ;;  %209 = sbr.rel (%p801_p10) target bundleno = 55 (0x37), region = 40 }
  0x2e   : > { %s823_s9 = sshll.u32 %s1319_s16, 5 }
  0x2f   : > { %s1199_s20 = scalar_lea.vmem %s1301_s3, %s823_s9 }
  0x32   : > { %vm210_vm0 = vcmask 7168   ;;  %v1076_v0 = vmov 0.0   ;;  %v1077_v1 = vmov -inf  }
  0x33   : > { %211 = vst.msk [vmem:[#allocation2] sm:$0xff] %vm210_vm0, %v1076_v0  ;;  %212 = vst.msk [vmem:[#allocation2 + $0x8] sm:$0xff] %vm210_vm0, %v1076_v0 }
  0x34   : > { %213 = vst.msk [vmem:[#allocation2 + $0x10] sm:$0xff] %vm210_vm0, %v1076_v0  ;;  %214 = vst.msk [vmem:[#allocation2 + $0x18] sm:$0xff] %vm210_vm0, %v1076_v0 }
  0x35   : > { %215 = vst.msk [vmem:[#allocation3] sm:$0xff] %vm210_vm0, %v1077_v1  ;;  %216 = vst.msk [vmem:[#allocation3 + $0x8] sm:$0xff] %vm210_vm0, %v1077_v1 }
  0x36   : > { %217 = vst.msk [vmem:[#allocation3 + $0x10] sm:$0xff] %vm210_vm0, %v1077_v1  ;;  %218 = vst.msk [vmem:[#allocation3 + $0x18] sm:$0xff] %vm210_vm0, %v1077_v1 }
  0x37 PF: > { %v1202_v2 = vld [vmem:[%s178_s10] sm:$0xff]  ;;  %v1204_v3 = vld [vmem:[%s178_s10 + $0x8] sm:$0xff]  ;;  %v221_v4 = vld [vmem:[%s178_s10 + $0x10] sm:$0xff]  ;;  %p802_p7 = scmp.eq.s32.totalorder %s1054_s15, 1 }
  0x38   : > { %v222_v5 = vld [vmem:[%s178_s10 + $0x18] sm:$0xff] }
  0x39   : > { %226 = sbr.rel (%p802_p7) target bundleno = 215 (0xd7), region = 44 }
  0x3e   : > { %235 = vadd.xlane.f32.xlu1 %v221_v4  ;;  %231 = vadd.xlane.f32.xlu0 %v1202_v2  ;;  %v229_v6 = vld [vmem:[#allocation2 + $0x10] sm:$0xff]  ;;  %v227_v7 = vld [vmem:[#allocation2] sm:$0xff]  ;;  %vm243_vm1 = vcmask 7168   ;;  %v230_v12 = vld [vmem:[#allocation2 + $0x18] sm:$0xff] }
  0x3f   : > { %v228_v13 = vld [vmem:[#allocation2 + $0x8] sm:$0xff]  ;;  %v248_v19 = vld [vmem:[#allocation3] sm:$0xff]  ;;  %v251_v24 = vld [vmem:[#allocation3 + $0x18] sm:$0xff] }
  0x40   : > { %v249_v18 = vld [vmem:[#allocation3 + $0x8] sm:$0xff]  ;;  %v250_v25 = vld [vmem:[#allocation3 + $0x10] sm:$0xff] }
  0x42   : > { %237 = vadd.xlane.f32.xlu1 %v222_v5  ;;  %233 = vadd.xlane.f32.xlu0 %v1204_v3 }
  0x46   : > { %254 = vmax.xlane.f32.xlu1 %v1204_v3  ;;  %252 = vmax.xlane.f32.xlu0 %v1202_v2 }
  0x4a   : > { %258 = vmax.xlane.f32.xlu1 %v222_v5  ;;  %256 = vmax.xlane.f32.xlu0 %v221_v4 }
  0xc7   : > { %v236_v8 = vpop.xlane.xlu1 %235  ;;  %v232_v9 = vpop.xlane.xlu0 %231 }
  0xc8   : > { %v241_v10 = vadd.f32 %v236_v8, %v229_v6  ;;  %v239_v11 = vadd.f32 %v232_v9, %v227_v7 }
  0xca   : > { %246 = vst.msk [vmem:[#allocation2 + $0x10] sm:$0xff] %vm243_vm1, %v241_v10  ;;  %244 = vst.msk [vmem:[#allocation2] sm:$0xff] %vm243_vm1, %v239_v11 }
  0xcb   : > { %v238_v14 = vpop.xlane.xlu1 %237  ;;  %v234_v15 = vpop.xlane.xlu0 %233 }
  0xcc   : > { %v242_v16 = vadd.f32 %v238_v14, %v230_v12  ;;  %v240_v17 = vadd.f32 %v234_v15, %v228_v13 }
  0xce   : > { %247 = vst.msk [vmem:[#allocation2 + $0x18] sm:$0xff] %vm243_vm1, %v242_v16  ;;  %245 = vst.msk [vmem:[#allocation2 + $0x8] sm:$0xff] %vm243_vm1, %v240_v17 }
  0xcf   : > { %v255_v20 = vpop.xlane.xlu1 %254  ;;  %v253_v21 = vpop.xlane.xlu0 %252 }
  0xd0   : > { %v261_v22 = vmax.f32 %v249_v18, %v255_v20  ;;  %v260_v23 = vmax.f32 %v248_v19, %v253_v21 }
  0xd2   : > { %265 = vst.msk [vmem:[#allocation3 + $0x8] sm:$0xff] %vm243_vm1, %v261_v22  ;;  %264 = vst.msk [vmem:[#allocation3] sm:$0xff] %vm243_vm1, %v260_v23 }
  0xd3   : > { %v259_v26 = vpop.xlane.xlu1 %258  ;;  %v257_v27 = vpop.xlane.xlu0 %256 }
  0xd4   : > { %v263_v28 = vmax.f32 %v251_v24, %v259_v26  ;;  %v262_v29 = vmax.f32 %v250_v25, %v257_v27 }
  0xd6   : > { %267 = vst.msk [vmem:[#allocation3 + $0x18] sm:$0xff] %vm243_vm1, %v263_v28  ;;  %266 = vst.msk [vmem:[#allocation3 + $0x10] sm:$0xff] %vm243_vm1, %v262_v29 }
  0xd7 PF: > { %p803_p11 = scmp.ne.s32.totalorder %s1054_s15, 1 }
  0xd8   : > { %s804_s16 = sshll.u32 (!%p803_p11), %s1054_s15, 7 }
  0xd9   : > { %271 = sbr.rel (%p803_p11) target bundleno = 824 (0x338), region = 48 }
  0xde   : > { %v273_v30 = vlaneseq  ;;  %v275_v31 = vstv %s804_s16  ;;  %v1078_v42 = vmov 0.0   ;;  %vm1079_vm3 = vmmov 0   ;;  %v291_v43 = vld [vmem:[#allocation2 + $0x18] sm:$0xff]  ;;  %v290_v49 = vld [vmem:[#allocation2 + $0x10] sm:$0xff]  ;;  %v289_v50 = vld [vmem:[#allocation2 + $0x8] sm:$0xff] }
  0xdf   : > { %844 = vmatprep.subr.mxu0 %v1078_v42  ;;  %855 = vmatprep.subr.mxu1 %v1078_v42  ;;  %v312_v44 = vld [vmem:[#allocation3 + $0x18] sm:$0xff]  ;;  %vm304_vm4 = vcmask 7168   ;;  %v311_v55 = vld [vmem:[#allocation3 + $0x10] sm:$0xff]  ;;  %v288_v56 = vld [vmem:[#allocation2] sm:$0xff]  ;;  %vm342_vm5 = vcmask 261120   ;;  %vm492_vm6 = vcmask 15360  }
  0xe0   : > { %v274_v32 = vand.u32 127, %v273_v30  ;;  %852 = vmatprep.mubr.msk.f32.mxu0 %vm1079_vm3, %v1078_v42  ;;  %863 = vmatprep.mubr.msk.f32.mxu1 %vm1079_vm3, %v1078_v42  ;;  %v310_v61 = vld [vmem:[#allocation3 + $0x8] sm:$0xff]  ;;  %v309_v0 = vld [vmem:[#allocation3] sm:$0xff]  ;;  %vm505_vm7 = vcmask 1041408   ;;  %v490_v21 = vld [vmem:[%s1300_s2 + $0x10] sm:$0xff] }
  0xe1   : > { %v341_v13 = vld [vmem:[%s1299_s1] sm:$0x3]  ;;  %v489_v20 = vld [vmem:[%s1300_s2 + $0x8] sm:$0xff]  ;;  %v491_v25 = vld [vmem:[%s1300_s2 + $0x18] sm:$0xff] }
  0xe2   : > { %v276_v33 = vadd.s32 %v275_v31, %v274_v32  ;;  %v488_v16 = vld [vmem:[%s1300_s2] sm:$0xff] }
  0xe4   : > { %vm277_vm2 = vcmp.lt.s32.totalorder %v276_v33, 210 }
  0xe5   : > { %v283_v34 = vsel %vm277_vm2, %v222_v5, 0.0  ;;  %v287_v35 = vsel %vm277_vm2, %v222_v5, -inf  ;;  %v282_v36 = vsel %vm277_vm2, %v221_v4, 0.0  ;;  %v281_v37 = vsel %vm277_vm2, %v1204_v3, 0.0 }
  0xe6   : > { %298 = vadd.xlane.f32.xlu0 %v283_v34  ;;  %319 = vmax.xlane.f32.xlu1 %v287_v35  ;;  %v286_v38 = vsel %vm277_vm2, %v221_v4, -inf  ;;  %v280_v39 = vsel %vm277_vm2, %v1202_v2, 0.0  ;;  %v285_v40 = vsel %vm277_vm2, %v1204_v3, -inf  ;;  %v284_v41 = vsel %vm277_vm2, %v1202_v2, -inf }
  0xea   : > { %296 = vadd.xlane.f32.xlu0 %v282_v36  ;;  %294 = vadd.xlane.f32.xlu1 %v281_v37 }
  0xee   : > { %317 = vmax.xlane.f32.xlu0 %v286_v38  ;;  %292 = vadd.xlane.f32.xlu1 %v280_v39 }
  0xf2   : > { %315 = vmax.xlane.f32.xlu0 %v285_v40  ;;  %313 = vmax.xlane.f32.xlu1 %v284_v41 }
 0x16f   : > { %v299_v45 = vpop.xlane.xlu0 %298  ;;  %v320_v46 = vpop.xlane.xlu1 %319 }
 0x170   : > { %v303_v47 = vadd.f32 %v299_v45, %v291_v43  ;;  %v324_v48 = vmax.f32 %v312_v44, %v320_v46 }
 0x172   : > { %308 = vst.msk [vmem:[#allocation2 + $0x18] sm:$0xff] %vm304_vm4, %v303_v47  ;;  %328 = vst.msk [vmem:[#allocation3 + $0x18] sm:$0xff] %vm304_vm4, %v324_v48 }
 0x173   : > { %v297_v51 = vpop.xlane.xlu0 %296  ;;  %v295_v52 = vpop.xlane.xlu1 %294 }
 0x174   : > { %v302_v53 = vadd.f32 %v297_v51, %v290_v49  ;;  %v301_v54 = vadd.f32 %v295_v52, %v289_v50 }
 0x176   : > { %307 = vst.msk [vmem:[#allocation2 + $0x10] sm:$0xff] %vm304_vm4, %v302_v53  ;;  %306 = vst.msk [vmem:[#allocation2 + $0x8] sm:$0xff] %vm304_vm4, %v301_v54 }
 0x177   : > { %v318_v57 = vpop.xlane.xlu0 %317  ;;  %v293_v58 = vpop.xlane.xlu1 %292 }
 0x178   : > { %v323_v59 = vmax.f32 %v311_v55, %v318_v57  ;;  %v300_v60 = vadd.f32 %v293_v58, %v288_v56 }
 0x179   : > { %v332_v62 = vld [vmem:[#allocation2 + $0x18] sm:$0xff] }
 0x17a   : > { %v340_v63 = vld [vmem:[#allocation3 + $0x18] sm:$0xff]  ;;  %327 = vst.msk [vmem:[#allocation3 + $0x10] sm:$0xff] %vm304_vm4, %v323_v59  ;;  %305 = vst.msk [vmem:[#allocation2] sm:$0xff] %vm304_vm4, %v300_v60  ;;  %v336_v1 = vmul.f32 0.004761905, %v332_v62 }
 0x17b   : > { %856 = vmatpush3.msra.mxu1 %v340_v63  ;;  %v316_v2 = vpop.xlane.xlu0 %315  ;;  %v314_v3 = vpop.xlane.xlu1 %313 }
 0x17c   : > { %857 = vmatprep.subr.mxu1 %v1078_v42  ;;  %v322_v4 = vmax.f32 %v310_v61, %v316_v2  ;;  %845 = vmatpush3.msra.mxu0 %v336_v1  ;;  %v321_v5 = vmax.f32 %v309_v0, %v314_v3 }
 0x17d   : > { %846 = vmatprep.subr.mxu0 %v1078_v42  ;;  %v331_v6 = vld [vmem:[#allocation2 + $0x10] sm:$0xff]  ;;  %v330_v7 = vld [vmem:[#allocation2 + $0x8] sm:$0xff] }
 0x17e   : > { %326 = vst.msk [vmem:[#allocation3 + $0x8] sm:$0xff] %vm304_vm4, %v322_v4  ;;  %325 = vst.msk [vmem:[#allocation3] sm:$0xff] %vm304_vm4, %v321_v5  ;;  %v335_v8 = vmul.f32 0.004761905, %v331_v6  ;;  %v334_v9 = vmul.f32 0.004761905, %v330_v7 }
 0x180   : > { %847 = vmatpush3.msra.mxu0 %v335_v8 }
 0x181   : > { %848 = vmatprep.subr.mxu0 %v1078_v42  ;;  %v339_v10 = vld [vmem:[#allocation3 + $0x10] sm:$0xff]  ;;  %v329_v11 = vld [vmem:[#allocation2] sm:$0xff] }
 0x182   : > { %849 = vmatpush3.msra.mxu0 %v334_v9  ;;  %858 = vmatpush3.msra.mxu1 %v339_v10  ;;  %v333_v12 = vmul.f32 0.004761905, %v329_v11 }
 0x183   : > { %850 = vmatprep.subr.mxu0 %v1078_v42  ;;  %859 = vmatprep.subr.mxu1 %v1078_v42 }
 0x184   : > { %851 = vmatpush3.msra.mxu0 %v333_v12 }
 0x185   : > { %v338_v14 = vld [vmem:[#allocation3 + $0x8] sm:$0xff]  ;;  %853 = vmatmul.mubr.msk.f32.vlgmr.msra.gmra.mxu0 %vm342_vm5, %v341_v13  ;;  %v337_v15 = vld [vmem:[#allocation3] sm:$0xff] }
 0x186   : > { %860 = vmatpush3.msra.mxu1 %v338_v14  ;;  %868 = vmatprep.mubr.msk.f32.mxu0 %vm492_vm6, %v488_v16 }
 0x187   : > { %861 = vmatprep.subr.mxu1 %v1078_v42 }
 0x188   : > { %862 = vmatpush3.msra.mxu1 %v337_v15 }
 0x189   : > { %864 = vmatmul.mubr.msk.f32.vlgmr.msra.gmra.mxu1 %vm342_vm5, %v341_v13 }
 0x18a   : > { %876 = vmatprep.mubr.msk.f32.mxu1 %vm492_vm6, %v488_v16 }
 0x245   : > { %v412_v17 = vpop.f32.mrf.mxu0 }
 0x246   : > { %v416_v18 = vmax.f32 %v412_v17, 0.0 }
 0x247   : > { %v854_v19 = vpop.f32.mrf.mxu0 }
 0x248   : > { %874 = vmatprep.subr.msk.mxu1 %vm505_vm7, %v416_v18 }
 0x249   : > { %v483_v22 = vpop.f32.mrf.mxu1  ;;  %875 = vmatpush3.msk.msra.mxu1 %vm505_vm7, %v416_v18 }
 0x24a   : > { %v487_v23 = vmax.f32 %v483_v22, 0.0  ;;  %877 = vmatmul.mubr.msk.f32.vlgmr.msra.gmra.mxu1 %vm492_vm6, %v489_v20 }
 0x24b   : > { %v865_v24 = vpop.f32.mrf.mxu1  ;;  %879 = vmatprep.mubr.msk.f32.mxu1 %vm492_vm6, %v490_v21 }
 0x24c   : > { %866 = vmatprep.subr.msk.mxu0 %vm505_vm7, %v487_v23 }
 0x24d   : > { %867 = vmatpush3.msk.msra.mxu0 %vm505_vm7, %v487_v23 }
 0x24e   : > { %869 = vmatmul.mubr.msk.f32.vlgmr.msra.gmra.mxu0 %vm492_vm6, %v489_v20  ;;  %880 = vmatmul.mubr.msk.f32.gmra.mxu1 %vm492_vm6, %v491_v25 }
 0x24f   : > { %871 = vmatprep.mubr.msk.f32.mxu0 %vm492_vm6, %v490_v21 }
 0x252   : > { %872 = vmatmul.mubr.msk.f32.gmra.mxu0 %vm492_vm6, %v491_v25 }
 0x30a   : > { %v878_v26 = vpop.f32.mrf.mxu1 }
 0x30c   : > { %v663_v27 = vpop.f32.mrf.mxu1 }
 0x30e   : > { %v870_v28 = vpop.f32.mrf.mxu0  ;;  %v881_v31 = vpop.f32.mrf.mxu1 }
 0x30f   : > { %v669_v29 = vadd.f32 %v878_v26, %v870_v28 }
 0x310   : > { %v575_v30 = vpop.f32.mrf.mxu0  ;;  %v673_v38 = vpop.f32.mrf.mxu1 }
 0x311   : > { %v818_v32 = vmul.f32 -1.442695, %v669_v29  ;;  %v664_v33 = vadd.f32 %v663_v27, %v575_v30 }
 0x312   : > { %v873_v34 = vpop.f32.mrf.mxu0 }
 0x313   : > { %960 = vpow2.f32 %v818_v32  ;;  %v817_v35 = vmul.f32 -1.442695, %v664_v33  ;;  %v679_v36 = vadd.f32 %v881_v31, %v873_v34 }
 0x314   : > { %v585_v37 = vpop.f32.mrf.mxu0 }
 0x315   : > { %962 = vpow2.f32 %v817_v35  ;;  %v820_v39 = vmul.f32 -1.442695, %v679_v36  ;;  %v674_v40 = vadd.f32 %v673_v38, %v585_v37 }
 0x317   : > { %964 = vpow2.f32 %v820_v39  ;;  %v819_v41 = vmul.f32 -1.442695, %v674_v40 }
 0x319   : > { %966 = vpow2.f32 %v819_v41 }
 0x320   : > { %v961_v42 = vpop.eup %960 }
 0x321   : > { %v695_v43 = vadd.f32 1.0, %v961_v42 }
 0x322   : > { %v963_v44 = vpop.eup %962 }
 0x323   : > { %968 = vrcp.f32 %v695_v43  ;;  %v694_v45 = vadd.f32 1.0, %v963_v44 }
 0x324   : > { %v965_v46 = vpop.eup %964 }
 0x325   : > { %970 = vrcp.f32 %v694_v45  ;;  %v697_v47 = vadd.f32 1.0, %v965_v46 }
 0x326   : > { %v967_v48 = vpop.eup %966 }
 0x327   : > { %972 = vrcp.f32 %v697_v47  ;;  %v696_v49 = vadd.f32 1.0, %v967_v48 }
 0x329   : > { %974 = vrcp.f32 %v696_v49 }
 0x330   : > { %v969_v50 = vpop.eup %968 }
 0x331   : > { %707 = vst.msk [vmem:[%s1199_s20 + $0x8] sm:$0xff] %vm304_vm4, %v969_v50 }
 0x332   : > { %v971_v51 = vpop.eup %970 }
 0x333   : > { %706 = vst.msk [vmem:[%s1199_s20] sm:$0xff] %vm304_vm4, %v971_v51 }
 0x334   : > { %v973_v52 = vpop.eup %972 }
 0x335   : > { %709 = vst.msk [vmem:[%s1199_s20 + $0x18] sm:$0xff] %vm304_vm4, %v973_v52 }
 0x336   : > { %v975_v53 = vpop.eup %974 }
 0x337   : > { %708 = vst.msk [vmem:[%s1199_s20 + $0x10] sm:$0xff] %vm304_vm4, %v975_v53 }
 0x338 PF: > { %s16_s19 = sadd.s32 1, %s1070_s19   ;;  %s1305_s12 = smov %s1046_s13 }
 0x339   : > { %p13_p12 = scmp.ge.s32.totalorder %s16_s19, 6   ;;  %s1306_s13 = smov %s1050_s14 }
 0x33a   : > { %s1307_s14 = smov %s1167_s5  ;;  %s1308_s15 = smov %s1062_s17 }
 0x33b   : > { %s1309_s16 = smov %s1066_s18  ;;  %s1310_s17 = smov %s1313_s21 }
 0x33c   : > { %s1311_s18 = smov %s1317_s22  ;;  %15 = sbr.rel (!%p13_p12) target bundleno = 5 (0x5), region = 84 }
 0x341   :  { %731 = vsyncpa [#allocation5], 1 }
 0x342   :  { %733 = vsyncpa [#allocation5 + $0x1], 1 }

</bundles_post_ra>
